<compile_context>
chip_gen: v6e
topology: v6e:2x2x1
jax: 0.10.0
libtpu: 0.0.40
codegen_flags: <defaults>
</compile_context>

<pallas_src>
import functools

import jax
import jax.numpy as jnp
import numpy as np
from jax import lax
from jax.experimental import pallas as pl
from jax.experimental.pallas import tpu as pltpu


def _round_up(v, m):
    return (v + m - 1) // m * m


# --------------------------------- kernel ------------------------------------
def _temporal_block_kernel(x_ref, w1_ref, b1_ref, w2_ref, b2_ref, *rest,
                           K, dilation, pad, padh, num_t, has_downsample):
    if has_downsample:
        wds_ref, bds_ref, o_ref, xh_ref, hh_ref = rest
    else:
        o_ref, xh_ref, hh_ref = rest

    tb, tl, cip = x_ref.shape
    cop = o_ref.shape[-1]
    off = padh - pad                     # first history row the windows may touch
    t = pl.program_id(1)

    # At the first time tile of every batch tile the causal history is all zeros.
    @pl.when(t == 0)
    def _init():
        xh_ref[...] = jnp.zeros((tb, padh, cip), dtype=xh_ref.dtype)
        hh_ref[...] = jnp.zeros((tb, padh, cop), dtype=hh_ref.dtype)

    def causal_conv_relu(buf, w_ref, b_ref):
        # buf: (tb, padh + tl, c) bf16.  Fuse the K dilated taps into a single
        # (tb*tl, K*c) @ (K*c, cop) MXU contraction (lane-dense, c % 128 == 0).
        c = buf.shape[-1]
        cat = jnp.concatenate(
            [buf[:, off + j * dilation: off + j * dilation + tl, :] for j in range(K)],
            axis=-1)
        acc = jnp.dot(cat.reshape(tb * tl, K * c), w_ref[...],
                      preferred_element_type=jnp.float32).reshape(tb, tl, cop)
        # bias + ReLU in f32 (Dropout = identity in eval mode)
        return jnp.maximum(acc + b_ref[...], 0.0)

    x_tile = x_ref[...]                                           # (tb, tl, cip) bf16

    h1 = causal_conv_relu(jnp.concatenate([xh_ref[...], x_tile], axis=1),
                          w1_ref, b1_ref)
    h1b = h1.astype(jnp.bfloat16)
    h2 = causal_conv_relu(jnp.concatenate([hh_ref[...], h1b], axis=1),
                          w2_ref, b2_ref)

    # Residual branch: 1x1 downsample conv iff C_in != C_out, else identity.
    if has_downsample:
        res = jnp.dot(x_tile.reshape(tb * tl, cip), wds_ref[...],
                      preferred_element_type=jnp.float32).reshape(tb, tl, cop)
        res = res + bds_ref[...]
    else:
        res = x_tile.astype(jnp.float32)

    o_ref[...] = jnp.maximum(h2 + res, 0.0).astype(o_ref.dtype)

    # Carry the causal history (last `padh` rows of x and h1) to the next time tile.
    if num_t > 1:
        xh_ref[...] = x_tile[:, tl - padh:, :]
        hh_ref[...] = h1b[:, tl - padh:, :]


# ------------------------------ per-block wrapper -----------------------------
def _run_block(x_nlc, ci, co, bp, *, K, tb, tl, out_dtype):
    """x_nlc: (Npad, Lpad, Cip) bf16, channel-padded to 128.  Returns (Npad, Lpad, Cop)."""
    npad, lpad, cip = x_nlc.shape
    cop = _round_up(co, 128)
    dilation = bp["dilation"]
    pad = (K - 1) * dilation
    padh = _round_up(pad, 8)
    nb, nt = npad // tb, lpad // tl
    has_ds = bp["wds"] is not None
    assert has_ds == (ci != co), "downsample must be present iff C_in != C_out"
    assert tl >= padh and tl % 8 == 0

    # Fold torch-layout (Co, Cin, K) weights into one lane-dense (K*Cip, Cop) bf16
    # matrix so all K dilated taps become a single MXU contraction.
    def tap_cat(w_t, c_in_real, c_in_pad):
        m = jnp.zeros((K * c_in_pad, cop), jnp.float32)
        for j in range(K):
            m = m.at[j * c_in_pad:j * c_in_pad + c_in_real, :co].set(w_t[:, :, j].T)
        return m.astype(jnp.bfloat16)

    w1 = tap_cat(bp["w1"], ci, cip)
    w2 = tap_cat(bp["w2"], co, cop)
    b1 = jnp.zeros((1, cop), jnp.float32).at[0, :co].set(bp["b1"])
    b2 = jnp.zeros((1, cop), jnp.float32).at[0, :co].set(bp["b2"])

    args = [x_nlc, w1, b1, w2, b2]
    in_specs = [
        pl.BlockSpec((tb, tl, cip), lambda b, t: (b, t, 0)),
        pl.BlockSpec((K * cip, cop), lambda b, t: (0, 0)),
        pl.BlockSpec((1, cop), lambda b, t: (0, 0)),
        pl.BlockSpec((K * cop, cop), lambda b, t: (0, 0)),
        pl.BlockSpec((1, cop), lambda b, t: (0, 0)),
    ]
    if has_ds:
        wds = (jnp.zeros((cip, cop), jnp.float32)
               .at[:ci, :co].set(bp["wds"][:, :, 0].T).astype(jnp.bfloat16))
        bds = jnp.zeros((1, cop), jnp.float32).at[0, :co].set(bp["bds"])
        args += [wds, bds]
        in_specs += [pl.BlockSpec((cip, cop), lambda b, t: (0, 0)),
                     pl.BlockSpec((1, cop), lambda b, t: (0, 0))]

    out_itemsize = jnp.dtype(out_dtype).itemsize
    weight_bytes = sum(int(a.size) * a.dtype.itemsize for a in args[1:])
    flops = int(2 * npad * lpad * (K * cip * cop + K * cop * cop
                                   + (cip * cop if has_ds else 0)))
    bytes_accessed = int(npad * lpad * (cip * 2 + cop * out_itemsize) + weight_bytes)

    # VMEM residency estimate: double-buffered tiles + resident weights + carries + temps.
    tile_bytes = tb * tl * (cip * 2 + cop * out_itemsize)
    scratch_bytes = tb * padh * (cip + cop) * 2
    temp_bytes = tb * tl * (K * cip * 2 + K * cop * 2 + 4 * cop * 4)
    est = 2 * tile_bytes + weight_bytes + scratch_bytes + temp_bytes
    vmem_limit = int(min(max(2 * est + (8 << 20), 32 << 20), 64 << 20))

    kern = functools.partial(
        _temporal_block_kernel, K=K, dilation=dilation, pad=pad, padh=padh,
        num_t=nt, has_downsample=has_ds)

    return pl.pallas_call(
        kern,
        out_shape=jax.ShapeDtypeStruct((npad, lpad, cop), out_dtype),
        grid=(nb, nt),
        in_specs=in_specs,
        out_specs=pl.BlockSpec((tb, tl, cop), lambda b, t: (b, t, 0)),
        scratch_shapes=[pltpu.VMEM((tb, padh, cip), jnp.bfloat16),   # x history carry
                        pltpu.VMEM((tb, padh, cop), jnp.bfloat16)],  # h1 history carry
        compiler_params=pltpu.CompilerParams(
            dimension_semantics=("parallel", "arbitrary"),
            vmem_limit_bytes=vmem_limit),
        cost_estimate=pl.CostEstimate(flops=flops, transcendentals=0,
                                      bytes_accessed=bytes_accessed),
    )(*args)


# ------------------------------ network wrapper -------------------------------
def temporal_conv_net(x_ncl, blocks, *, kernel_size, time_tile=256, batch_tile=8):
    """Forward of TemporalConvNet.  x_ncl: (N, C_in, L) like the PyTorch module."""
    K = kernel_size
    assert K >= 2, "Chomp1d-based causal conv assumes kernel_size >= 2"
    n, c_in, L = x_ncl.shape

    max_pad = max((K - 1) * bp["dilation"] for bp in blocks)
    tb = max(1, min(batch_tile, n))
    npad = _round_up(n, tb)
    tl = _round_up(min(time_tile, L), 16)
    tl = max(tl, _round_up(max_pad, 16))          # carry needs TL >= padh for all blocks
    lpad = _round_up(L, tl)

    # Single NCL->NLC transpose + batch/time/channel padding for the whole stack
    # (hoisted out of the per-block kernels); channels padded to 128 lanes.
    x = jnp.transpose(x_ncl, (0, 2, 1)).astype(jnp.float32)
    cip0 = _round_up(c_in, 128)
    x = jnp.pad(x, ((0, npad - n), (0, lpad - L), (0, cip0 - c_in)))
    cur = x.astype(jnp.bfloat16)

    cur_c = c_in
    for i, bp in enumerate(blocks):
        out_c = bp["w1"].shape[0]
        last = i == len(blocks) - 1
        cur = _run_block(cur, cur_c, out_c, bp, K=K, tb=tb, tl=tl,
                         out_dtype=jnp.float32 if last else jnp.bfloat16)
        cur_c = out_c

    out = cur[:n, :L, :cur_c].astype(jnp.float32)
    return jnp.transpose(out, (0, 2, 1))                       # back to NCL


# ----------------------------- pure-JAX reference -----------------------------
def _torch_conv1d_ref(x_ncl, w_oik, b, *, stride, padding, dilation):
    y = lax.conv_general_dilated(
        x_ncl, w_oik, window_strides=(stride,), padding=[(padding, padding)],
        rhs_dilation=(dilation,), dimension_numbers=("NCH", "OIH", "NCH"))
    return y + b[None, :, None]


def temporal_block_ref(x_ncl, w1_t, b1, w2_t, b2, wds_t, bds,
                       *, kernel_size, stride, dilation, padding):
    y = _torch_conv1d_ref(x_ncl, w1_t, b1, stride=stride,
                          padding=padding, dilation=dilation)
    y = jnp.maximum(y[:, :, :-padding], 0.0)                   # Chomp1d + ReLU
    y = _torch_conv1d_ref(y, w2_t, b2, stride=stride,
                          padding=padding, dilation=dilation)
    y = jnp.maximum(y[:, :, :-padding], 0.0)
    res = x_ncl if wds_t is None else _torch_conv1d_ref(
        x_ncl, wds_t, bds, stride=1, padding=0, dilation=1)
    return jnp.maximum(y + res, 0.0)


def temporal_conv_net_ref(x_ncl, blocks, *, kernel_size):
    cur = x_ncl
    for bp in blocks:
        pad = (kernel_size - 1) * bp["dilation"]
        cur = temporal_block_ref(cur, bp["w1"], bp["b1"], bp["w2"], bp["b2"],
                                 bp["wds"], bp["bds"], kernel_size=kernel_size,
                                 stride=1, dilation=bp["dilation"], padding=pad)
    return cur


# ------------------------------ deterministic init -----------------------------
def _weight_norm_eff(vkey, gkey, shape):
    """Effective weight of torch weight_norm (dim=0): g * v / ||v||."""
    v = 0.01 * jax.random.normal(vkey, shape, jnp.float32)      # init_weights: N(0, 0.01)
    g = jax.random.uniform(gkey, (shape[0],), jnp.float32, 0.5, 1.5)
    norm = jnp.sqrt(jnp.sum(v * v, axis=(1, 2), keepdims=True))
    return g[:, None, None] * v / norm


if __name__ == "__main__":
    # Small TemporalConvNet: num_inputs=4, hidden=[8, 8], kernel_size=3, L=32, N=2.
    num_inputs = 4
    num_hidden = [8, 8]
    kernel_size = 3
    N, L = 2, 32

    key = jax.random.PRNGKey(0)
    keys = iter(jax.random.split(key, 64))
    snap = lambda a: a.astype(jnp.bfloat16).astype(jnp.float32)  # bf16-representable f32

    blocks = []
    in_c = num_inputs
    for i, out_c in enumerate(num_hidden):
        d = 2 ** i
        w1 = snap(_weight_norm_eff(next(keys), next(keys), (out_c, in_c, kernel_size)))
        w2 = snap(_weight_norm_eff(next(keys), next(keys), (out_c, out_c, kernel_size)))
        b1 = 0.05 * jax.random.normal(next(keys), (out_c,), jnp.float32)
        b2 = 0.05 * jax.random.normal(next(keys), (out_c,), jnp.float32)
        if in_c != out_c:
            wds = snap(0.01 * jax.random.normal(next(keys), (out_c, in_c, 1), jnp.float32))
            bds = 0.05 * jax.random.normal(next(keys), (out_c,), jnp.float32)
        else:
            wds, bds = None, None
        blocks.append(dict(w1=w1, b1=b1, w2=w2, b2=b2, wds=wds, bds=bds, dilation=d))
        in_c = out_c

    x = snap(jax.random.normal(next(keys), (N, num_inputs, L), jnp.float32))  # NCL

    # time_tile=16 forces two time tiles -> exercises the cross-tile causal carry.
    out = temporal_conv_net(x, blocks, kernel_size=kernel_size,
                            time_tile=16, batch_tile=8)
    out = jax.block_until_ready(out)

    ref = temporal_conv_net_ref(x, blocks, kernel_size=kernel_size)
    np.testing.assert_allclose(np.asarray(out), np.asarray(ref), rtol=2e-2, atol=2e-2)

    # TODO(synk): training-mode Dropout (stochastic masking) is not implemented;
    # this kernel reproduces the eval-mode (identity) forward pass.
    print("KERNEL_OK")
</pallas_src>

<mosaic_0001>
module attributes {stable_mosaic.version = 11 : i64} {
  func.func @_temporal_block_kernel(%arg0: i32, %arg1: i32, %arg2: memref<2x16x128xbf16, #tpu.memory_space<vmem>>, %arg3: memref<384x128xbf16, #tpu.memory_space<vmem>>, %arg4: memref<1x128xf32, #tpu.memory_space<vmem>>, %arg5: memref<384x128xbf16, #tpu.memory_space<vmem>>, %arg6: memref<1x128xf32, #tpu.memory_space<vmem>>, %arg7: memref<128x128xbf16, #tpu.memory_space<vmem>>, %arg8: memref<1x128xf32, #tpu.memory_space<vmem>>, %arg9: memref<2x16x128xbf16, #tpu.memory_space<vmem>>, %arg10: memref<2x8x128xbf16, #tpu.memory_space<vmem>>, %arg11: memref<2x8x128xbf16, #tpu.memory_space<vmem>>) attributes {dimension_semantics = [#tpu.dimension_semantics<parallel>, #tpu.dimension_semantics<arbitrary>], iteration_bounds = array<i64: 1, 2>, scalar_prefetch = 0 : i64, scratch_operands = 2 : i64, tpu.core_type = #tpu.core_type<tc>, window_params = [{transform_indices = @transform_0, window_bounds = array<i64: 2, 16, 128>}, {pipeline_mode = #tpu.pipeline_mode<synchronous>, transform_indices = @transform_1, window_bounds = array<i64: 384, 128>}, {pipeline_mode = #tpu.pipeline_mode<synchronous>, transform_indices = @transform_2, window_bounds = array<i64: 1, 128>}, {pipeline_mode = #tpu.pipeline_mode<synchronous>, transform_indices = @transform_3, window_bounds = array<i64: 384, 128>}, {pipeline_mode = #tpu.pipeline_mode<synchronous>, transform_indices = @transform_4, window_bounds = array<i64: 1, 128>}, {pipeline_mode = #tpu.pipeline_mode<synchronous>, transform_indices = @transform_5, window_bounds = array<i64: 128, 128>}, {pipeline_mode = #tpu.pipeline_mode<synchronous>, transform_indices = @transform_6, window_bounds = array<i64: 1, 128>}, {transform_indices = @transform_7, window_bounds = array<i64: 2, 16, 128>}]} {
    %c0_i32 = arith.constant 0 : i32
    %0 = arith.cmpi eq, %arg1, %c0_i32 : i32
    %1 = arith.extui %0 : i1 to i32
    %c0_i32_0 = arith.constant 0 : i32
    %2 = arith.cmpi ne, %1, %c0_i32_0 : i32
    scf.if %2 {
      %cst_35 = arith.constant 0.000000e+00 : bf16
      %54 = vector.broadcast %cst_35 : bf16 to vector<2x8x128xbf16>
      %c0_36 = arith.constant 0 : index
      %c0_37 = arith.constant 0 : index
      %c0_38 = arith.constant 0 : index
      %55 = vector.load %arg10[%c0_36, %c0_37, %c0_38] : memref<2x8x128xbf16, #tpu.memory_space<vmem>>, vector<2x8x128xbf16>
      tpu.vector_store %arg10[%c0_36, %c0_37, %c0_38], %54 {strides = array<i32>} : memref<2x8x128xbf16, #tpu.memory_space<vmem>>, vector<2x8x128xbf16>,
      %cst_39 = arith.constant 0.000000e+00 : bf16
      %56 = vector.broadcast %cst_39 : bf16 to vector<2x8x128xbf16>
      %c0_40 = arith.constant 0 : index
      %c0_41 = arith.constant 0 : index
      %c0_42 = arith.constant 0 : index
      %57 = vector.load %arg11[%c0_40, %c0_41, %c0_42] : memref<2x8x128xbf16, #tpu.memory_space<vmem>>, vector<2x8x128xbf16>
      tpu.vector_store %arg11[%c0_40, %c0_41, %c0_42], %56 {strides = array<i32>} : memref<2x8x128xbf16, #tpu.memory_space<vmem>>, vector<2x8x128xbf16>,
    } else {
    }
    %c0 = arith.constant 0 : index
    %c0_1 = arith.constant 0 : index
    %c0_2 = arith.constant 0 : index
    %3 = vector.load %arg2[%c0, %c0_1, %c0_2] : memref<2x16x128xbf16, #tpu.memory_space<vmem>>, vector<2x16x128xbf16>
    %c0_3 = arith.constant 0 : index
    %c0_4 = arith.constant 0 : index
    %c0_5 = arith.constant 0 : index
    %4 = vector.load %arg10[%c0_3, %c0_4, %c0_5] : memref<2x8x128xbf16, #tpu.memory_space<vmem>>, vector<2x8x128xbf16>
    %5 = tpu.concatenate %4, %3 in 1 : vector<2x8x128xbf16>, vector<2x16x128xbf16> -> vector<2x24x128xbf16>
    %6 = vector.extract_strided_slice %5 {offsets = [0, 6, 0], sizes = [2, 16, 128], strides = [1, 1, 1]} : vector<2x24x128xbf16> to vector<2x16x128xbf16>
    %7 = vector.extract_strided_slice %5 {offsets = [0, 7, 0], sizes = [2, 16, 128], strides = [1, 1, 1]} : vector<2x24x128xbf16> to vector<2x16x128xbf16>
    %8 = vector.extract_strided_slice %5 {offsets = [0, 8, 0], sizes = [2, 16, 128], strides = [1, 1, 1]} : vector<2x24x128xbf16> to vector<2x16x128xbf16>
    %9 = tpu.concatenate %6, %7, %8 in 2 : vector<2x16x128xbf16>, vector<2x16x128xbf16>, vector<2x16x128xbf16> -> vector<2x16x384xbf16>
    %10 = vector.shape_cast %9 : vector<2x16x384xbf16> to vector<32x384xbf16>
    %c0_6 = arith.constant 0 : index
    %c0_7 = arith.constant 0 : index
    %11 = vector.load %arg3[%c0_6, %c0_7] : memref<384x128xbf16, #tpu.memory_space<vmem>>, vector<384x128xbf16>
    %cst = arith.constant dense<0.000000e+00> : vector<32x128xf32>
    %12 = tpu.matmul %10, %11, %cst {dimension_numbers = #tpu.dot_dimension_numbers<[1], [0], [0], [1], [0, 0, 1, 1], [], []>} : vector<32x384xbf16>, vector<384x128xbf16>, vector<32x128xf32> -> vector<32x128xf32>
    %13 = vector.shape_cast %12 : vector<32x128xf32> to vector<2x16x128xf32>
    %c0_8 = arith.constant 0 : index
    %c0_9 = arith.constant 0 : index
    %14 = vector.load %arg4[%c0_8, %c0_9] : memref<1x128xf32, #tpu.memory_space<vmem>>, vector<1x128xf32>
    %15 = vector.shape_cast %14 : vector<1x128xf32> to vector<1x1x128xf32>
    %16 = vector.broadcast %15 : vector<1x1x128xf32> to vector<2x16x128xf32>
    %17 = arith.addf %13, %16 : vector<2x16x128xf32>
    %cst_10 = arith.constant 0.000000e+00 : f32
    %18 = vector.broadcast %cst_10 : f32 to vector<2x16x128xf32>
    %19 = arith.maximumf %17, %18 : vector<2x16x128xf32>
    %20 = arith.truncf %19 : vector<2x16x128xf32> to vector<2x16x128xbf16>
    %c0_11 = arith.constant 0 : index
    %c0_12 = arith.constant 0 : index
    %c0_13 = arith.constant 0 : index
    %21 = vector.load %arg11[%c0_11, %c0_12, %c0_13] : memref<2x8x128xbf16, #tpu.memory_space<vmem>>, vector<2x8x128xbf16>
    %22 = tpu.concatenate %21, %20 in 1 : vector<2x8x128xbf16>, vector<2x16x128xbf16> -> vector<2x24x128xbf16>
    %23 = vector.extract_strided_slice %22 {offsets = [0, 6, 0], sizes = [2, 16, 128], strides = [1, 1, 1]} : vector<2x24x128xbf16> to vector<2x16x128xbf16>
    %24 = vector.extract_strided_slice %22 {offsets = [0, 7, 0], sizes = [2, 16, 128], strides = [1, 1, 1]} : vector<2x24x128xbf16> to vector<2x16x128xbf16>
    %25 = vector.extract_strided_slice %22 {offsets = [0, 8, 0], sizes = [2, 16, 128], strides = [1, 1, 1]} : vector<2x24x128xbf16> to vector<2x16x128xbf16>
    %26 = tpu.concatenate %23, %24, %25 in 2 : vector<2x16x128xbf16>, vector<2x16x128xbf16>, vector<2x16x128xbf16> -> vector<2x16x384xbf16>
    %27 = vector.shape_cast %26 : vector<2x16x384xbf16> to vector<32x384xbf16>
    %c0_14 = arith.constant 0 : index
    %c0_15 = arith.constant 0 : index
    %28 = vector.load %arg5[%c0_14, %c0_15] : memref<384x128xbf16, #tpu.memory_space<vmem>>, vector<384x128xbf16>
    %cst_16 = arith.constant dense<0.000000e+00> : vector<32x128xf32>
    %29 = tpu.matmul %27, %28, %cst_16 {dimension_numbers = #tpu.dot_dimension_numbers<[1], [0], [0], [1], [0, 0, 1, 1], [], []>} : vector<32x384xbf16>, vector<384x128xbf16>, vector<32x128xf32> -> vector<32x128xf32>
    %30 = vector.shape_cast %29 : vector<32x128xf32> to vector<2x16x128xf32>
    %c0_17 = arith.constant 0 : index
    %c0_18 = arith.constant 0 : index
    %31 = vector.load %arg6[%c0_17, %c0_18] : memref<1x128xf32, #tpu.memory_space<vmem>>, vector<1x128xf32>
    %32 = vector.shape_cast %31 : vector<1x128xf32> to vector<1x1x128xf32>
    %33 = vector.broadcast %32 : vector<1x1x128xf32> to vector<2x16x128xf32>
    %34 = arith.addf %30, %33 : vector<2x16x128xf32>
    %cst_19 = arith.constant 0.000000e+00 : f32
    %35 = vector.broadcast %cst_19 : f32 to vector<2x16x128xf32>
    %36 = arith.maximumf %34, %35 : vector<2x16x128xf32>
    %37 = vector.shape_cast %3 : vector<2x16x128xbf16> to vector<32x128xbf16>
    %c0_20 = arith.constant 0 : index
    %c0_21 = arith.constant 0 : index
    %38 = vector.load %arg7[%c0_20, %c0_21] : memref<128x128xbf16, #tpu.memory_space<vmem>>, vector<128x128xbf16>
    %cst_22 = arith.constant dense<0.000000e+00> : vector<32x128xf32>
    %39 = tpu.matmul %37, %38, %cst_22 {dimension_numbers = #tpu.dot_dimension_numbers<[1], [0], [0], [1], [0, 0, 1, 1], [], []>} : vector<32x128xbf16>, vector<128x128xbf16>, vector<32x128xf32> -> vector<32x128xf32>
    %40 = vector.shape_cast %39 : vector<32x128xf32> to vector<2x16x128xf32>
    %c0_23 = arith.constant 0 : index
    %c0_24 = arith.constant 0 : index
    %41 = vector.load %arg8[%c0_23, %c0_24] : memref<1x128xf32, #tpu.memory_space<vmem>>, vector<1x128xf32>
    %42 = vector.shape_cast %41 : vector<1x128xf32> to vector<1x1x128xf32>
    %43 = vector.broadcast %42 : vector<1x1x128xf32> to vector<2x16x128xf32>
    %44 = arith.addf %40, %43 : vector<2x16x128xf32>
    %45 = arith.addf %36, %44 : vector<2x16x128xf32>
    %cst_25 = arith.constant 0.000000e+00 : f32
    %46 = vector.broadcast %cst_25 : f32 to vector<2x16x128xf32>
    %47 = arith.maximumf %45, %46 : vector<2x16x128xf32>
    %48 = arith.truncf %47 : vector<2x16x128xf32> to vector<2x16x128xbf16>
    %c0_26 = arith.constant 0 : index
    %c0_27 = arith.constant 0 : index
    %c0_28 = arith.constant 0 : index
    %49 = vector.load %arg9[%c0_26, %c0_27, %c0_28] : memref<2x16x128xbf16, #tpu.memory_space<vmem>>, vector<2x16x128xbf16>
    tpu.vector_store %arg9[%c0_26, %c0_27, %c0_28], %48 {strides = array<i32>} : memref<2x16x128xbf16, #tpu.memory_space<vmem>>, vector<2x16x128xbf16>,
    %50 = vector.extract_strided_slice %3 {offsets = [0, 8, 0], sizes = [2, 8, 128], strides = [1, 1, 1]} : vector<2x16x128xbf16> to vector<2x8x128xbf16>
    %c0_29 = arith.constant 0 : index
    %c0_30 = arith.constant 0 : index
    %c0_31 = arith.constant 0 : index
    %51 = vector.load %arg10[%c0_29, %c0_30, %c0_31] : memref<2x8x128xbf16, #tpu.memory_space<vmem>>, vector<2x8x128xbf16>
    tpu.vector_store %arg10[%c0_29, %c0_30, %c0_31], %50 {strides = array<i32>} : memref<2x8x128xbf16, #tpu.memory_space<vmem>>, vector<2x8x128xbf16>,
    %52 = vector.extract_strided_slice %20 {offsets = [0, 8, 0], sizes = [2, 8, 128], strides = [1, 1, 1]} : vector<2x16x128xbf16> to vector<2x8x128xbf16>
    %c0_32 = arith.constant 0 : index
    %c0_33 = arith.constant 0 : index
    %c0_34 = arith.constant 0 : index
    %53 = vector.load %arg11[%c0_32, %c0_33, %c0_34] : memref<2x8x128xbf16, #tpu.memory_space<vmem>>, vector<2x8x128xbf16>
    tpu.vector_store %arg11[%c0_32, %c0_33, %c0_34], %52 {strides = array<i32>} : memref<2x8x128xbf16, #tpu.memory_space<vmem>>, vector<2x8x128xbf16>,
    return
  }
  func.func @transform_0(%arg0: i32, %arg1: i32) -> (i32, i32, i32) {
    %c0_i32 = arith.constant 0 : i32
    %c0_i32_0 = arith.constant 0 : i32
    return %arg0, %arg1, %c0_i32 : i32, i32, i32
  }
  func.func @transform_1(%arg0: i32, %arg1: i32) -> (i32, i32) {
    %c0_i32 = arith.constant 0 : i32
    %c0_i32_0 = arith.constant 0 : i32
    %c0_i32_1 = arith.constant 0 : i32
    return %c0_i32, %c0_i32_0 : i32, i32
  }
  func.func @transform_2(%arg0: i32, %arg1: i32) -> (i32, i32) {
    %c0_i32 = arith.constant 0 : i32
    %c0_i32_0 = arith.constant 0 : i32
    %c0_i32_1 = arith.constant 0 : i32
    return %c0_i32, %c0_i32_0 : i32, i32
  }
  func.func @transform_3(%arg0: i32, %arg1: i32) -> (i32, i32) {
    %c0_i32 = arith.constant 0 : i32
    %c0_i32_0 = arith.constant 0 : i32
    %c0_i32_1 = arith.constant 0 : i32
    return %c0_i32, %c0_i32_0 : i32, i32
  }
  func.func @transform_4(%arg0: i32, %arg1: i32) -> (i32, i32) {
    %c0_i32 = arith.constant 0 : i32
    %c0_i32_0 = arith.constant 0 : i32
    %c0_i32_1 = arith.constant 0 : i32
    return %c0_i32, %c0_i32_0 : i32, i32
  }
  func.func @transform_5(%arg0: i32, %arg1: i32) -> (i32, i32) {
    %c0_i32 = arith.constant 0 : i32
    %c0_i32_0 = arith.constant 0 : i32
    %c0_i32_1 = arith.constant 0 : i32
    return %c0_i32, %c0_i32_0 : i32, i32
  }
  func.func @transform_6(%arg0: i32, %arg1: i32) -> (i32, i32) {
    %c0_i32 = arith.constant 0 : i32
    %c0_i32_0 = arith.constant 0 : i32
    %c0_i32_1 = arith.constant 0 : i32
    return %c0_i32, %c0_i32_0 : i32, i32
  }
  func.func @transform_7(%arg0: i32, %arg1: i32) -> (i32, i32, i32) {
    %c0_i32 = arith.constant 0 : i32
    %c0_i32_0 = arith.constant 0 : i32
    return %arg0, %arg1, %c0_i32 : i32, i32, i32
  }
}

</mosaic_0001>

<bundles_post_ra>
// kernel: tpu_custom_call.1
= control target key start
LH: loop header
LB: loop body
LE: loop exit
PB: predicated region body
PF: predicated region fallthrough
CT: control target
= control target key end

     0   :  { %s2419_s0 = inlined_call_operand.hbm [shape: bf16[2,32,128], index: 0, kind: input, shape index: {}]   ;;  %s2420_s1 = inlined_call_operand.hbm [shape: bf16[384,128], index: 1, kind: input, shape index: {}]   ;;  %s2421_s2 = inlined_call_operand.vmem [shape: f32[1,128], index: 2, kind: input, shape index: {}]   ;;  %s2422_s3 = inlined_call_operand.hbm [shape: bf16[384,128], index: 3, kind: input, shape index: {}]   ;;  %s2423_s4 = inlined_call_operand.vmem [shape: f32[1,128], index: 4, kind: input, shape index: {}]   ;;  %s2424_s5 = inlined_call_operand.hbm [shape: bf16[128,128], index: 5, kind: input, shape index: {}]   ;;  %s2425_s6 = inlined_call_operand.vmem [shape: f32[1,128], index: 6, kind: input, shape index: {}]   ;;  %s2426_s7 = inlined_call_operand.hbm [shape: bf16[2,32,128], index: 7, kind: output, shape index: {}]  }
   0x1   :  { %2429 = sst [smem:[#allocation24_spill]] %s2420_s1 }
   0x2   :  { %2430 = sst [smem:[#allocation25_spill]] %s2422_s3 }
   0x3   :  { %2431 = sst [smem:[#allocation26_spill]] %s2424_s5 }
   0x4   :  { %12 = vsyncpa [#allocation5], 0 }
   0x5   :  { %14 = vsyncpa [#allocation5 + $0x1], 0 }
   0x6   :  { %15 = vsyncpa [#allocation8], 0 }
   0x7   :  { %16 = vsyncpa [#allocation11], 0 }
   0x8   :  { %17 = vsyncpa [#allocation6], 0 }
   0x9   :  { %19 = vsyncpa [#allocation6 + $0x1], 0  ;;  %s2135_s24 = smov 0   ;;  %s2137_s25 = smov 0  }
   0xa   :  { %s2139_s26 = smov 0   ;;  %s2141_s27 = smov 0  }
   0xb   :  { %s2143_s28 = smov 0   ;;  %s2145_s29 = smov 0  }
   0xc LB: > { %s1490_s30 = sadd.s32 4294967295, %s2074_s29   ;;  %s1491_s8 = sadd.s32 4294967294, %s2074_s29   ;;  %s2074_s29 = sphi %s2145_s29, %s25_s29   ;;  %s2070_s28 = sphi %s2143_s28, %s2452_s28   ;;  %s2066_s27 = sphi %s2141_s27, %s2451_s27   ;;  %s2062_s26 = sphi %s2139_s26, %s2450_s26   ;;  %s2058_s25 = sphi %s2137_s25, %s2449_s25   ;;  %s2054_s24 = sphi %s2135_s24, %s2448_s24  }
   0xd   : > { %s34_s9 = sadd.s32 1, %s2070_s28  ;;  %s46_s10 = sadd.s32 1, %s2062_s26 }
   0xe   : > { %p35_p0 = scmp.ge.s32.totalorder %s34_s9, 2  ;;  %p53_p1 = scmp.ne.s32.totalorder %s2062_s26, %s2058_s25 }
   0xf   : > { %p54_p2 = scmp.eq.s32.totalorder %s2074_s29, 0  ;;  %p59_p3 = scmp.ne.s32.totalorder %s2058_s25, %s2054_s24 }
  0x10   : > { %s2454_s9 = smov (%p35_p0, %s34_s9), 0  ;;  %p2180_p5 = scmp.eq.s32.totalorder %s1490_s30, 0 }
  0x11   : > { %2432 = sst [smem:[#allocation22_spill]] %s2454_s9  ;;  %p2176_p4 = por %p54_p2, %p53_p1 }
  0x12   : > { %s42_s13 = ssub.s32 %s2070_s28, %s2454_s9  ;;  %p211_p6 = scmp.eq.s32.totalorder %s1490_s30, 1 }
  0x13   : > { %p44_p7 = scmp.eq.s32.totalorder %s42_s13, 0  ;;  %p2188_p8 = por %p2180_p5, %p59_p3 }
  0x14   : > { %p2192_p9 = por %p211_p6, %p53_p1  ;;  %p217_p10 = scmp.eq.s32.totalorder %s1491_s8, 1 }
  0x15   : > { %s2197_s16 = scalar_select %p44_p7, %s2062_s26, %s46_s10  }
  0x16   : > { %s2436_s15 = scalar_select %p2192_p9, 1, 0 }
  0x17   : > { %2437 = sst [smem:[#allocation23_spill]] %s2197_s16  ;;  %p2199_p11 = por %p217_p10, %p59_p3 }
  0x18   : > { %p1492_p12 = scmp.ge.s32.totalorder %s2074_s29, 1  ;;  %p224_p13 = scmp.lt.s32.totalorder %s2074_s29, 3 }
  0x19   : > { %s2438_s17 = scalar_select %p2199_p11, 1, 0 }
  0x1a   : > { %p2205_p0 = pnand %p1492_p12, %p224_p13  ;;  %s2076_s19 = smov [#allocation7]  }
  0x1b   : > { %s236_s20 = sshll.u32 %s2076_s19, 4  ;;  %s2077_s21 = smov [#allocation9]   ;;  %s237_s20 = int_to_ptr.vmem [resolvable:$true] %s236_s20 }
  0x1c   : > { %p1784_p1 = pneg %p2205_p0  ;;  %s252_s22 = sshll.u32 %s2077_s21, 4  ;;  %s2217_s22 = int_to_ptr.vmem [resolvable:$true] %s252_s22 }
  0x1d   : > { %s2078_s30 = smov [#allocation10]   ;;  %s1945_s10 = scalar_lea.vmem %s237_s20, 3072 }
  0x1e   : > { %p2213_p2 = pnand %p1784_p1, %p2180_p5  ;;  %s268_s8 = sshll.u32 %s2078_s30, 4  ;;  %s2219_s8 = int_to_ptr.vmem [resolvable:$true] %s268_s8 }
  0x1f   : > { %p1946_p6 = scmp.ne.s32.totalorder %s237_s20, %s1945_s10  ;;  %p1953_p12 = scmp.lt.s32.totalorder %s237_s20, %s237_s20 }
  0x20   : > { %p1936_p3 = pneg %p2213_p2  ;;  %p1954_p13 = scmp.lt.s32.totalorder %s1945_s10, %s1945_s10 }
  0x22   : > { %p1948_p7 = pnand %p1946_p6, %p1936_p3  ;;  %p1955_p1 = por %p1954_p13, %p1953_p12 }
  0x24   : > { %p1949_p10 = pneg %p1948_p7 }
  0x26   : > { %p1956_p11 = pnand %p1955_p1, %p1949_p10 }
  0x28   : > { %1959 = shalt.err (!%p1956_p11)
}
  0x29   : > { %s2079_s13 = smov 64   ;;  %s2080_s19 = smov 4  }
  0x2a   : > { %s2441_s1 = sld [smem:[#allocation24_spill]]  ;;  %s1971_s9 = scalar_lea.vmem %s2217_s22, 3072 }
  0x2b   : > { %p1972_p6 = scmp.ne.s32.totalorder %s2217_s22, %s1971_s9  ;;  %p1979_p11 = scmp.lt.s32.totalorder %s2217_s22, %s2217_s22 }
  0x2c   : > { %p1980_p10 = scmp.lt.s32.totalorder %s1971_s9, %s1971_s9 }
  0x2d   : > { %p1974_p7 = pnand %p1972_p6, %p1936_p3 }
  0x2e   : > { %p1981_p13 = por %p1980_p10, %p1979_p11 }
  0x2f   : > { %p1975_p12 = pneg %p1974_p7 }
  0x30   : > { %1787 = dma.hbm_to_vmem [thread:$0]  (!%p2213_p2), %s2441_s1, 3072, %s237_s20, [#allocation8], %s2079_s13, %s2079_s13, %s2080_s19  }
  0x31   : > { %p1982_p1 = pnand %p1981_p13, %p1975_p12 }
  0x33   : > { %1985 = shalt.err (!%p1982_p1)
}
  0x34   : > { %s2442_s3 = sld [smem:[#allocation25_spill]]  ;;  %s1997_s20 = scalar_lea.vmem %s2219_s8, 1024 }
  0x35   : > { %p1998_p6 = scmp.ne.s32.totalorder %s2219_s8, %s1997_s20  ;;  %p2005_p12 = scmp.lt.s32.totalorder %s2219_s8, %s2219_s8 }
  0x36   : > { %p2006_p11 = scmp.lt.s32.totalorder %s1997_s20, %s1997_s20 }
  0x37   : > { %p2000_p7 = pnand %p1998_p6, %p1936_p3 }
  0x38   : > { %p2007_p10 = por %p2006_p11, %p2005_p12 }
  0x39   : > { %p2001_p9 = pneg %p2000_p7 }
  0x3a   : > { %1790 = dma.hbm_to_vmem [thread:$0]  (!%p2213_p2), %s2442_s3, 3072, %s2217_s22, [#allocation8], %s2079_s13, %s2079_s13, %s2080_s19  }
  0x3b   : > { %p2008_p13 = pnand %p2007_p10, %p2001_p9 }
  0x3d   : > { %2011 = shalt.err (!%p2008_p13)
}
  0x3e   : > { %s2443_s5 = sld [smem:[#allocation26_spill]]  ;;  %p1496_p1 = scmp.ge.s32.totalorder %s2074_s29, 2 }
  0x40   : > { %281 = sbr.rel (%p1496_p1) target bundleno = 82 (0x52), region = 40 }
  0x44   : > { %1793 = dma.hbm_to_vmem [thread:$0]  (!%p2213_p2), %s2443_s5, 1024, %s2219_s8, [#allocation11], %s2079_s13, %s2079_s13, %s2080_s19  }
  0x45   : > { %s285_s22 = sand.u32 1, %s2062_s26   ;;  %s1585_s21 = sshll.u32 %s2070_s28, 7 }
  0x46   : > { %s1497_s23 = sshll.u32 %s285_s22, 4  ;;  %s298_s8 = scalar_lea.hbm %s2419_s0, %s1585_s21 }
  0x47   : > { %s1761_s13 = scalar_select %p2176_p4, [#allocation0], [#allocation17] }
  0x48   : > { %s289_s19 = scalar_lea.vmem [#allocation4], %s1497_s23  ;;  %s2081_s16 = smov 256  }
  0x49   : > { %s311_s20 = sshll.u32 %s289_s19, 4  ;;  %s303_s9 = sld [smem:[%s1761_s13]]   ;;  %s312_s20 = int_to_ptr.vmem [resolvable:$true] %s311_s20 }
  0x4a   : > { %1762 = sst [smem:[#allocation14]] (%p2176_p4), %s2081_s16  ;;  %s2082_s1 = smov 128  }
  0x4b   : > { %1763 = sst [smem:[#allocation14 + $0x1]] (%p2176_p4), %s2082_s1  ;;  %s2083_s3 = smov 2  }
  0x4c   : > { %1764 = sst [smem:[#allocation14 + $0x2]] (%p2176_p4), %s2083_s3  ;;  %s2084_s5 = smov 64  }
  0x4d   : > { %1765 = sst [smem:[#allocation14 + $0x3]] (%p2176_p4), %s2084_s5  ;;  %s2085_s23 = smov 4  }
  0x4e   : > { %1766 = sst [smem:[#allocation14 + $0x4]] (%p2176_p4), %s2084_s5  ;;  %s286_s10 = scalar_lea.sflag [#allocation5], %s285_s22 }
  0x4f   : > { %s1500_s21 = sshll.u32 %s303_s9, 26  ;;  %1767 = sst [smem:[#allocation14 + $0x5]] (%p2176_p4), %s2085_s23 }
  0x50   : > { %s1501_s30 = sadd.s32 134217728, %s1500_s21  ;;  %s2086_s13 = smov 131072  }
  0x51   : > { %1768 = dma.general (%p2176_p4), %s298_s8, 256, %s312_s20, %s286_s10, %s2086_s13, [#allocation14], %s1501_s30, 0  }
  0x52 PF: > { %336 = sbr.rel (%p2205_p0) target bundleno = 610 (0x262), region = 48  ;;  %s2284_s1 = sand.u32 (!%p2205_p0), 1, %s2058_s25  }
  0x53   : > { %s1503_s3 = sshll.u32 (!%p2205_p0), %s2284_s1, 4  ;;  %s339_s5 = scalar_lea.sflag (!%p2205_p0), [#allocation5], %s2284_s1 }
  0x54   : > { %s2288_s19 = scalar_lea.vmem (!%p2205_p0), [#allocation4], %s1503_s3 }
  0x57   : > { %2037 = dma.done.wait (%p2188_p8), %s339_s5, 256  }
  0x58   : > { %2039 = vsyncadd (%p2188_p8), %s339_s5, 4294967040 }
  0x59   : > { %2041 = dma.done.wait (%p2180_p5), [#allocation8], 6144  }
  0x5a   : > { %2043 = vsyncadd (%p2180_p5), [#allocation8], 4294961152 }
  0x5b   : > { %2045 = dma.done.wait (%p2180_p5), [#allocation11], 1024  }
  0x5c   : > { %2047 = vsyncadd (%p2180_p5), [#allocation11], 4294966272  ;;  %s2302_s11 = scalar_lea.vmem [#allocation12], %s1503_s3  ;;  %p1508_p4 = scmp.ne.s32.totalorder %s2066_s27, 0 }
  0x5e   : > { %393 = sbr.rel (%p1508_p4) target bundleno = 102 (0x66), region = 68 }
  0x63   : > { %v2087_v0 = vmov 0  }
  0x64   : > { %394 = vst [vmem:[#allocation2] sm:$0xf] %v2087_v0  ;;  %395 = vst [vmem:[#allocation2 + $0x4] sm:$0xf] %v2087_v0 }
  0x65   : > { %396 = vst [vmem:[#allocation3] sm:$0xf] %v2087_v0  ;;  %397 = vst [vmem:[#allocation3 + $0x4] sm:$0xf] %v2087_v0 }
  0x66 PF: > { %v1872_v1 = vld [vmem:[#allocation7 + $0x78] sm:$0xff]   ;;  %v1875_v4 = vld [vmem:[#allocation7 + $0x70] sm:$0xff]   ;;  %v1878_v7 = vld [vmem:[#allocation7 + $0x68] sm:$0xff]   ;;  %vm416_vm0 = vcmask 1043456   ;;  %vm461_vm1 = vcmask 1044480   ;;  %vm454_vm2 = vcmask 1046528  }
  0x67   : > { %v1873_v2 = vld [vmem:[#allocation7 + $0xb8] sm:$0xff]   ;;  %1609 = vmatprep.subr.bf16.mxu0 %v1872_v1  ;;  %v1876_v5 = vld [vmem:[#allocation7 + $0xb0] sm:$0xff]   ;;  %v1879_v8 = vld [vmem:[#allocation7 + $0xa8] sm:$0xff]   ;;  %vm423_vm3 = vsmask.f32 7424  ;;  %s1335_s9 = scalar_lea.sflag [#allocation6], %s2284_s1 }
  0x68   : > { %v1874_v3 = vld [vmem:[#allocation7 + $0x38] sm:$0xff]   ;;  %1695 = vmatprep.subr.bf16.mxu1 %v1873_v2  ;;  %v1877_v6 = vld [vmem:[#allocation7 + $0x30] sm:$0xff]   ;;  %v1880_v9 = vld [vmem:[#allocation7 + $0x28] sm:$0xff]  }
  0x69   : > { %1610 = vmatpush3.bf16.msra.mxu0 %v1874_v3  ;;  %1696 = vmatpush3.bf16.msra.mxu1 %v1873_v2  ;;  %v1881_v10 = vld [vmem:[#allocation7 + $0x60] sm:$0xff]   ;;  %v1884_v13 = vld [vmem:[#allocation7 + $0x58] sm:$0xff]   ;;  %v1887_v16 = vld [vmem:[#allocation7 + $0x50] sm:$0xff]  }
  0x6a   : > { %1611 = vmatprep.subr.bf16.mxu0 %v1875_v4  ;;  %1697 = vmatprep.subr.bf16.mxu1 %v1876_v5  ;;  %v1882_v11 = vld [vmem:[#allocation7 + $0xa0] sm:$0xff]   ;;  %v1885_v14 = vld [vmem:[#allocation7 + $0x98] sm:$0xff]   ;;  %v1888_v17 = vld [vmem:[#allocation7 + $0x90] sm:$0xff]  }
  0x6b   : > { %v1883_v12 = vld [vmem:[#allocation7 + $0x20] sm:$0xff]   ;;  %v1886_v15 = vld [vmem:[#allocation7 + $0x18] sm:$0xff]   ;;  %v1889_v18 = vld [vmem:[#allocation7 + $0x10] sm:$0xff]  }
  0x6c   : > { %v1890_v19 = vld [vmem:[#allocation7 + $0x48] sm:$0xff]   ;;  %v1893_v22 = vld [vmem:[#allocation7 + $0x40] sm:$0xff]   ;;  %v402_v26 = vld [vmem:[#allocation2] sm:$0xf] }
  0x6d   : > { %1612 = vmatpush3.bf16.msra.mxu0 %v1877_v6  ;;  %1698 = vmatpush3.bf16.msra.mxu1 %v1876_v5  ;;  %v1891_v20 = vld [vmem:[#allocation7 + $0x88] sm:$0xff]   ;;  %v1894_v23 = vld [vmem:[#allocation7 + $0x80] sm:$0xff]   ;;  %v403_v31 = vld [vmem:[#allocation2 + $0x4] sm:$0xf] }
  0x6e   : > { %1613 = vmatprep.subr.bf16.mxu0 %v1878_v7  ;;  %1699 = vmatprep.subr.bf16.mxu1 %v1879_v8  ;;  %v1892_v21 = vld [vmem:[#allocation7 + $0x8] sm:$0xff]   ;;  %v2306_v24 = vld [vmem:[%s2288_s19] sm:$0xf]  ;;  %v2309_v25 = vld [vmem:[%s2288_s19 + $0x4] sm:$0xf] }
  0x6f   : > { %v1509_v27 = vcombine.low %v2306_v24, %v2306_v24  ;;  %v1510_v28 = vcombine.low %v2309_v25, %v2309_v25  ;;  %1324 = vst [vmem:[#allocation2] sm:$0xf] %v2309_v25  ;;  %v2317_v29 = vld [vmem:[%s2288_s19 + $0x8] sm:$0xf]  ;;  %v2320_v30 = vld [vmem:[%s2288_s19 + $0xc] sm:$0xf] }
  0x70   : > { %v1511_v32 = vcombine.low %v2317_v29, %v2317_v29  ;;  %v2326_v33 = vcombine.low %v2320_v30, %v2320_v30  ;;  %v1895_v34 = vld [vmem:[#allocation7] sm:$0xff]   ;;  %1325 = vst [vmem:[#allocation2 + $0x4] sm:$0xf] %v2320_v30  ;;  %v1900_v47 = vld [vmem:[#allocation9 + $0x78] sm:$0xff]  }
  0x71   : > { %1614 = vmatpush3.bf16.msra.mxu0 %v1880_v9  ;;  %1700 = vmatpush3.bf16.msra.mxu1 %v1879_v8  ;;  %v419_v35 = vsel %vm416_vm0, %v402_v26, %v1509_v27  ;;  %v431_v36 = vshll.u32 %v1510_v28, 16  ;;  %v435_v37 = vshrl.u32 %v1510_v28, 16  ;;  %v456_v38 = vrot.slane %v1510_v28, 1  ;;  %v1901_v7 = vld [vmem:[#allocation9 + $0x38] sm:$0xff]   ;;  %v1909_v26 = vld [vmem:[#allocation9 + $0xa8] sm:$0xff]   ;;  %v1910_v27 = vld [vmem:[#allocation9 + $0x20] sm:$0xff]  }
  0x72   : > { %1615 = vmatprep.subr.bf16.mxu0 %v1881_v10  ;;  %1701 = vmatprep.subr.bf16.mxu1 %v1882_v11  ;;  %v424_v39 = vshrl.u32 %v419_v35, 16  ;;  %v426_v40 = vshll.u32 %v419_v35, 16  ;;  %v455_v41 = vrot.slane %v419_v35, 1  ;;  %v462_v42 = vrot.slane %v419_v35, 3  ;;  %v1916_v35 = vld [vmem:[#allocation9 + $0x10] sm:$0xff]  }
  0x73   : > { %v433_v43 = vrot.slane %v431_v36, 1  ;;  %v469_v44 = vrot.slane %v456_v38, 3  ;;  %v463_v45 = vrot.slane %v1510_v28, 3  ;;  %v422_v46 = vsel %vm416_vm0, %v403_v31, %v1511_v32  ;;  %v1911_v28 = vld [vmem:[#allocation9 + $0x58] sm:$0xff]   ;;  %v1912_v31 = vld [vmem:[#allocation9 + $0xa0] sm:$0xff]   ;;  %v1917_v36 = vld [vmem:[#allocation9 + $0x48] sm:$0xff]  }
  0x74   : > { %v428_v48 = vrot.slane %v426_v40, 1  ;;  %v457_v49 = vsel %vm454_vm2, %v455_v41, %v456_v38  ;;  %v458_v50 = vrot.slane %v422_v46, 1  ;;  %v459_v51 = vrot.slane %v2326_v33, 1  ;;  %v1913_v32 = vld [vmem:[#allocation9 + $0x18] sm:$0xff]   ;;  %v1919_v38 = vld [vmem:[#allocation9 + $0x8] sm:$0xff]   ;;  %v1922_v41 = vld [vmem:[#allocation9] sm:$0xff]  }
  0x75   : > { %1616 = vmatpush3.bf16.msra.mxu0 %v1883_v12  ;;  %1702 = vmatpush3.bf16.msra.mxu1 %v1882_v11  ;;  %v437_v52 = vor.u32 %v435_v37, %v433_v43  ;;  %v468_v53 = vrot.slane %v457_v49, 3  ;;  %v438_v54 = vshrl.u32 %v422_v46, 16  ;;  %v440_v58 = vshll.u32 %v422_v46, 16  ;;  %v1918_v37 = vld [vmem:[#allocation9 + $0x90] sm:$0xff]   ;;  %v1921_v40 = vld [vmem:[#allocation9 + $0x88] sm:$0xff]  }
  0x76   : > { %1617 = vmatprep.subr.bf16.mxu0 %v1884_v13  ;;  %1703 = vmatprep.subr.bf16.mxu1 %v1885_v14  ;;  %v429_v55 = vor.u32 %v428_v48, %v424_v39  ;;  %v460_v56 = vsel %vm454_vm2, %v458_v50, %v459_v51  ;;  %v478_v57 = vrot.slane %v459_v51, 3  ;;  %v445_v62 = vshll.u32 %v2326_v33, 16  ;;  %v1920_v39 = vld [vmem:[#allocation9 + $0x40] sm:$0xff]  }
  0x77   : > { %v466_v59 = vrot.slane %v437_v52, 3  ;;  %v470_v60 = vsel %vm461_vm1, %v468_v53, %v469_v44  ;;  %v477_v61 = vrot.slane %v460_v56, 3  ;;  %v442_v0 = vrot.slane %v440_v58, 1  ;;  %v1537_v52 = vld [vmem:[%s2421_s2] ss:$0 sm:$0xff] }
  0x78   : > { %v434_v63 = vsel %vm423_vm3, %v429_v55, %v433_v43  ;;  %1711 = vmatprep.mubr.bf16.mxu1 %v470_v60  ;;  %v449_v1 = vshrl.u32 %v2326_v33, 16  ;;  %v471_v2 = vrot.slane %v422_v46, 3  ;;  %v447_v5 = vrot.slane %v445_v62, 1  ;;  %v2345_v43 = vld [vmem:[#allocation10 + $0x38] sm:$0xff]  }
  0x79   : > { %1618 = vmatpush3.bf16.msra.mxu0 %v1886_v15  ;;  %1704 = vmatpush3.bf16.msra.mxu1 %v1885_v14  ;;  %v465_v3 = vrot.slane %v434_v63, 3  ;;  %v479_v4 = vsel %vm461_vm1, %v477_v61, %v478_v57  ;;  %v472_v6 = vrot.slane %v2326_v33, 3  ;;  %v464_v8 = vsel %vm461_vm1, %v462_v42, %v463_v45  ;;  %v1914_v33 = vld [vmem:[#allocation9 + $0x50] sm:$0xff]   ;;  %v1923_v42 = vld [vmem:[#allocation9 + $0x80] sm:$0xff]  }
  0x7a   : > { %1619 = vmatprep.subr.bf16.mxu0 %v1887_v16  ;;  %1705 = vmatprep.subr.bf16.mxu1 %v1888_v17  ;;  %v443_v9 = vor.u32 %v442_v0, %v438_v54  ;;  %v451_v11 = vor.u32 %v449_v1, %v447_v5 }
  0x7b   : > { %v467_v10 = vsel %vm461_vm1, %v465_v3, %v466_v59  ;;  %v473_v16 = vsel %vm461_vm1, %v471_v2, %v472_v6 }
  0x7c   : > { %710 = vmatprep.mubr.bf16.mxu0 %v467_v10  ;;  %v448_v12 = vsel %vm423_vm3, %v443_v9, %v447_v5  ;;  %v475_v14 = vrot.slane %v451_v11, 3  ;;  %v793_v5 = vld [vmem:[#allocation3] sm:$0xf] }
  0x7d   : > { %1620 = vmatpush3.bf16.msra.mxu0 %v1889_v18  ;;  %1706 = vmatpush3.bf16.msra.mxu1 %v1888_v17  ;;  %v474_v13 = vrot.slane %v448_v12, 3  ;;  %v1902_v17 = vld [vmem:[#allocation9 + $0x70] sm:$0xff]   ;;  %v1903_v18 = vld [vmem:[#allocation9 + $0xb8] sm:$0xff]  }
  0x7e   : > { %1621 = vmatprep.subr.bf16.mxu0 %v1890_v19  ;;  %1707 = vmatprep.subr.bf16.mxu1 %v1891_v20  ;;  %v1904_v19 = vld [vmem:[#allocation9 + $0x30] sm:$0xff]  }
  0x7f   : > { %v476_v15 = vsel %vm461_vm1, %v474_v13, %v475_v14 }
  0x81   : > { %1622 = vmatpush3.bf16.msra.mxu0 %v1892_v21  ;;  %1708 = vmatpush3.bf16.msra.mxu1 %v1891_v20  ;;  %v1905_v20 = vld [vmem:[#allocation9 + $0x68] sm:$0xff]   ;;  %v1906_v21 = vld [vmem:[#allocation9 + $0xb0] sm:$0xff]  }
  0x82   : > { %1623 = vmatprep.subr.bf16.mxu0 %v1893_v22  ;;  %1709 = vmatprep.subr.bf16.mxu1 %v1894_v23  ;;  %v1907_v22 = vld [vmem:[#allocation9 + $0x28] sm:$0xff]  }
  0x85   : > { %1624 = vmatpush3.bf16.msra.mxu0 %v1895_v34  ;;  %1710 = vmatpush3.bf16.msra.mxu1 %v1894_v23  ;;  %v1908_v23 = vld [vmem:[#allocation9 + $0x60] sm:$0xff]   ;;  %v1915_v34 = vld [vmem:[#allocation9 + $0x98] sm:$0xff]  }
  0x86   : > { %1647 = vmatprep.subr.bf16.mxu0 %v1900_v47  ;;  %1715 = vmatprep.subr.bf16.mxu1 %v1903_v18 }
  0x88   : > { %1712 = vmatmul.mubr.bf16.vlgmr.msra.gmra.mxu1 %v479_v4  ;;  %711 = vmatmul.mubr.bf16.vlgmr.msra.gmra.mxu0 %v464_v8 }
  0x89   : > { %1648 = vmatpush3.bf16.msra.mxu0 %v1901_v7  ;;  %718 = vmatprep.mubr.bf16.mxu0 %v476_v15 }
  0x8a   : > { %1649 = vmatprep.subr.bf16.mxu0 %v1902_v17  ;;  %1716 = vmatpush3.bf16.msra.mxu1 %v1903_v18 }
  0x8b   : > { %1717 = vmatprep.subr.bf16.mxu1 %v1906_v21 }
  0x8d   : > { %1650 = vmatpush3.bf16.msra.mxu0 %v1904_v19  ;;  %v794_v19 = vld [vmem:[#allocation3 + $0x4] sm:$0xf] }
  0x8e   : > { %1651 = vmatprep.subr.bf16.mxu0 %v1905_v20  ;;  %1718 = vmatpush3.bf16.msra.mxu1 %v1906_v21 }
  0x8f   : > { %1719 = vmatprep.subr.bf16.mxu1 %v1909_v26 }
  0x90   : > { %719 = vmatmul.mubr.bf16.gmra.mxu0 %v473_v16 }
  0x91   : > { %1652 = vmatpush3.bf16.msra.mxu0 %v1907_v22 }
  0x92   : > { %1653 = vmatprep.subr.bf16.mxu0 %v1908_v23  ;;  %1720 = vmatpush3.bf16.msra.mxu1 %v1909_v26 }
  0x93   : > { %1721 = vmatprep.subr.bf16.mxu1 %v1912_v31 }
  0x95   : > { %1654 = vmatpush3.bf16.msra.mxu0 %v1910_v27 }
  0x96   : > { %1655 = vmatprep.subr.bf16.mxu0 %v1911_v28  ;;  %1722 = vmatpush3.bf16.msra.mxu1 %v1912_v31 }
  0x97   : > { %1723 = vmatprep.subr.bf16.mxu1 %v1915_v34 }
  0x99   : > { %1656 = vmatpush3.bf16.msra.mxu0 %v1913_v32 }
  0x9a   : > { %1657 = vmatprep.subr.bf16.mxu0 %v1914_v33  ;;  %1724 = vmatpush3.bf16.msra.mxu1 %v1915_v34 }
  0x9b   : > { %1725 = vmatprep.subr.bf16.mxu1 %v1918_v37 }
  0x9d   : > { %1658 = vmatpush3.bf16.msra.mxu0 %v1916_v35 }
  0x9e   : > { %1659 = vmatprep.subr.bf16.mxu0 %v1917_v36  ;;  %1726 = vmatpush3.bf16.msra.mxu1 %v1918_v37 }
  0x9f   : > { %1727 = vmatprep.subr.bf16.mxu1 %v1921_v40 }
  0xa1   : > { %1660 = vmatpush3.bf16.msra.mxu0 %v1919_v38 }
  0xa2   : > { %1661 = vmatprep.subr.bf16.mxu0 %v1920_v39  ;;  %1728 = vmatpush3.bf16.msra.mxu1 %v1921_v40 }
  0xa3   : > { %1729 = vmatprep.subr.bf16.mxu1 %v1923_v42 }
  0xa5   : > { %1662 = vmatpush3.bf16.msra.mxu0 %v1922_v41 }
  0xa6   : > { %1735 = vmatprep.subr.bf16.mxu0 %v2345_v43  ;;  %1730 = vmatpush3.bf16.msra.mxu1 %v1923_v42 }
 0x148   : > { %v1713_v44 = vpop.f32.mrf.mxu1  ;;  %v1625_v45 = vpop.f32.mrf.mxu0 }
 0x14a   : > { %v761_v46 = vpop.f32.mrf.mxu1  ;;  %v1626_v47 = vpop.f32.mrf.mxu0 }
 0x14b   : > { %v1627_v48 = vadd.f32 %v1626_v47, %v1625_v45  ;;  %v1925_v47 = vld [vmem:[#allocation10 + $0x30] sm:$0xff]  }
 0x14c   : > { %v1628_v49 = vpop.f32.mrf.mxu0  ;;  %v1714_v50 = vpop.f32.mrf.mxu1 }
 0x14d   : > { %v762_v51 = vadd.f32 %v1627_v48, %v761_v46 }
 0x14e   : > { %v1629_v53 = vpop.f32.mrf.mxu0  ;;  %v764_v55 = vpop.f32.mrf.mxu1 }
 0x14f   : > { %v1630_v54 = vadd.f32 %v1629_v53, %v1628_v49  ;;  %v783_v57 = vadd.f32 %v1537_v52, %v762_v51 }
 0x150   : > { %v1631_v56 = vpop.f32.mrf.mxu0 }
 0x151   : > { %v765_v58 = vadd.f32 %v1630_v54, %v764_v55  ;;  %v787_v63 = vmax.f32 %v783_v57, 0.0 }
 0x152   : > { %v1632_v59 = vpop.f32.mrf.mxu0 }
 0x153   : > { %v784_v60 = vadd.f32 %v1537_v52, %v765_v58  ;;  %v1633_v61 = vadd.f32 %v1632_v59, %v1631_v56  ;;  %v1926_v59 = vld [vmem:[#allocation10 + $0x28] sm:$0xff]  }
 0x154   : > { %v1634_v62 = vpop.f32.mrf.mxu0 }
 0x155   : > { %v788_v0 = vmax.f32 %v784_v60, 0.0  ;;  %v770_v1 = vadd.f32 %v1713_v44, %v1633_v61 }
 0x156   : > { %v1635_v2 = vpop.f32.mrf.mxu0 }
 0x157   : > { %v791_v3 = vpack.c.bf16 %v788_v0, %v787_v63  ;;  %v1636_v4 = vadd.f32 %v1635_v2, %v1634_v62  ;;  %v785_v7 = vadd.f32 %v1537_v52, %v770_v1  ;;  %v1563_v1 = vcombine.low %v2306_v24, %v2309_v25  ;;  %v1931_v24 = vld [vmem:[#allocation10] sm:$0xff]  }
 0x158   : > { %v1564_v25 = vcombine.low %v2317_v29, %v2320_v30 }
 0x159   : > { %v797_v6 = vrot.slane %v791_v3, 4  ;;  %v773_v8 = vadd.f32 %v1714_v50, %v1636_v4  ;;  %v789_v15 = vmax.f32 %v785_v7, 0.0  ;;  %v1928_v4 = vld [vmem:[#allocation10 + $0x18] sm:$0xff]  }
 0x15b   : > { %v786_v9 = vadd.f32 %v1537_v52, %v773_v8  ;;  %v801_v10 = vsel %vm416_vm0, %v793_v5, %v797_v6  ;;  %v834_v11 = vrot.slane %v797_v6, 1  ;;  %v811_v12 = vshll.u32 %v797_v6, 16  ;;  %v1929_v5 = vld [vmem:[#allocation10 + $0x10] sm:$0xff]  }
 0x15c   : > { %v833_v13 = vrot.slane %v801_v10, 1  ;;  %v807_v14 = vshll.u32 %v801_v10, 16  ;;  %v815_v18 = vshrl.u32 %v797_v6, 16  ;;  %v805_v22 = vshrl.u32 %v801_v10, 16 }
 0x15d   : > { %v790_v16 = vmax.f32 %v786_v9, 0.0  ;;  %v813_v17 = vrot.slane %v811_v12, 1  ;;  %v846_v21 = vrot.slane %v834_v11, 3  ;;  %v839_v37 = vrot.slane %v801_v10, 3 }
 0x15e   : > { %v835_v20 = vsel %vm454_vm2, %v833_v13, %v834_v11  ;;  %v809_v23 = vrot.slane %v807_v14, 1  ;;  %v840_v38 = vrot.slane %v797_v6, 3  ;;  %v1930_v6 = vld [vmem:[#allocation10 + $0x8] sm:$0xff]  }
 0x15f   : > { %v792_v26 = vpack.c.bf16 %v790_v16, %v789_v15  ;;  %v1606_v27 = vpack.c.bf16 %v790_v16, %v788_v0  ;;  %v845_v28 = vrot.slane %v835_v20, 3  ;;  %v817_v31 = vor.u32 %v815_v18, %v813_v17 }
 0x160   : > { %v810_v32 = vor.u32 %v809_v23, %v805_v22  ;;  %v841_v50 = vsel %vm461_vm1, %v839_v37, %v840_v38 }
 0x161   : > { %v798_v33 = vrot.slane %v792_v26, 4  ;;  %1607 = vst [vmem:[#allocation3] sm:$0xff] %v1606_v27   ;;  %v847_v34 = vsel %vm461_vm1, %v845_v28, %v846_v21  ;;  %v843_v36 = vrot.slane %v817_v31, 3  ;;  %v1562_v26 = vld [vmem:[%s2423_s4] ss:$0 sm:$0xff] }
 0x162   : > { %1731 = vmatprep.mubr.bf16.mxu1 %v847_v34  ;;  %v814_v35 = vsel %vm423_vm3, %v810_v32, %v813_v17  ;;  %v1573_v27 = vld [vmem:[%s2425_s6] ss:$0 sm:$0xff] }
 0x163   : > { %v804_v39 = vsel %vm416_vm0, %v794_v19, %v798_v33  ;;  %v842_v40 = vrot.slane %v814_v35, 3  ;;  %v837_v41 = vrot.slane %v798_v33, 1  ;;  %v824_v42 = vshll.u32 %v798_v33, 16 }
 0x164   : > { %v836_v44 = vrot.slane %v804_v39, 1  ;;  %v820_v45 = vshll.u32 %v804_v39, 16  ;;  %v828_v49 = vshrl.u32 %v798_v33, 16  ;;  %v818_v52 = vshrl.u32 %v804_v39, 16 }
 0x165   : > { %v844_v46 = vsel %vm461_vm1, %v842_v40, %v843_v36  ;;  %v826_v48 = vrot.slane %v824_v42, 1  ;;  %v855_v55 = vrot.slane %v837_v41, 3  ;;  %v848_v61 = vrot.slane %v804_v39, 3 }
 0x166   : > { %1087 = vmatprep.mubr.bf16.mxu0 %v844_v46  ;;  %v838_v51 = vsel %vm454_vm2, %v836_v44, %v837_v41  ;;  %v822_v53 = vrot.slane %v820_v45, 1  ;;  %v849_v62 = vrot.slane %v798_v33, 3 }
 0x167   : > { %1088 = vmatmul.mubr.bf16.vlgmr.msra.gmra.mxu0 %v841_v50  ;;  %v854_v54 = vrot.slane %v838_v51, 3  ;;  %v830_v56 = vor.u32 %v828_v49, %v826_v48 }
 0x168   : > { %1736 = vmatpush3.bf16.msra.mxu0 %v2345_v43  ;;  %v823_v57 = vor.u32 %v822_v53, %v818_v52  ;;  %v1927_v43 = vld [vmem:[#allocation10 + $0x20] sm:$0xff]   ;;  %v850_v3 = vsel %vm461_vm1, %v848_v61, %v849_v62 }
 0x169   : > { %v856_v58 = vsel %vm461_vm1, %v854_v54, %v855_v55  ;;  %1737 = vmatprep.subr.bf16.mxu0 %v1925_v47  ;;  %v852_v0 = vrot.slane %v830_v56, 3 }
 0x16a   : > { %1732 = vmatmul.mubr.bf16.vlgmr.msra.gmra.mxu1 %v856_v58  ;;  %v827_v60 = vsel %vm423_vm3, %v823_v57, %v826_v48 }
 0x16b   : > { %v851_v63 = vrot.slane %v827_v60, 3 }
 0x16c   : > { %1738 = vmatpush3.bf16.msra.mxu0 %v1925_v47 }
 0x16d   : > { %v853_v2 = vsel %vm461_vm1, %v851_v63, %v852_v0  ;;  %1739 = vmatprep.subr.bf16.mxu0 %v1926_v59 }
 0x16e   : > { %1095 = vmatprep.mubr.bf16.mxu0 %v853_v2 }
 0x16f   : > { %1096 = vmatmul.mubr.bf16.gmra.mxu0 %v850_v3 }
 0x170   : > { %1740 = vmatpush3.bf16.msra.mxu0 %v1926_v59  ;;  %1751 = vmatprep.mubr.bf16.mxu0 %v1563_v1 }
 0x171   : > { %1741 = vmatprep.subr.bf16.mxu0 %v1927_v43 }
 0x174   : > { %1742 = vmatpush3.bf16.msra.mxu0 %v1927_v43 }
 0x175   : > { %1743 = vmatprep.subr.bf16.mxu0 %v1928_v4 }
 0x178   : > { %1744 = vmatpush3.bf16.msra.mxu0 %v1928_v4 }
 0x179   : > { %1745 = vmatprep.subr.bf16.mxu0 %v1929_v5 }
 0x17c   : > { %1746 = vmatpush3.bf16.msra.mxu0 %v1929_v5 }
 0x17d   : > { %1747 = vmatprep.subr.bf16.mxu0 %v1930_v6 }
 0x180   : > { %1748 = vmatpush3.bf16.msra.mxu0 %v1930_v6 }
 0x181   : > { %1749 = vmatprep.subr.bf16.mxu0 %v1931_v24 }
 0x184   : > { %1750 = vmatpush3.bf16.msra.mxu0 %v1931_v24 }
 0x187   : > { %1752 = vmatmul.mubr.bf16.vlgmr.msra.gmra.mxu0 %v1564_v25 }
 0x227   : > { %v1663_v7 = vpop.f32.mrf.mxu0 }
 0x229   : > { %v1664_v8 = vpop.f32.mrf.mxu0 }
 0x22a   : > { %v1733_v13 = vpop.f32.mrf.mxu1  ;;  %v1665_v19 = vadd.f32 %v1664_v8, %v1663_v7 }
 0x22b   : > { %v1666_v9 = vpop.f32.mrf.mxu0 }
 0x22c   : > { %v1138_v15 = vpop.f32.mrf.mxu1 }
 0x22d   : > { %v1667_v10 = vpop.f32.mrf.mxu0  ;;  %v1139_v29 = vadd.f32 %v1665_v19, %v1138_v15 }
 0x22e   : > { %v1734_v18 = vpop.f32.mrf.mxu1  ;;  %v1668_v21 = vadd.f32 %v1667_v10, %v1666_v9 }
 0x22f   : > { %v1669_v11 = vpop.f32.mrf.mxu0  ;;  %v1160_v33 = vadd.f32 %v1562_v26, %v1139_v29 }
 0x230   : > { %v1141_v23 = vpop.f32.mrf.mxu1 }
 0x231   : > { %v1670_v12 = vpop.f32.mrf.mxu0  ;;  %v1142_v28 = vadd.f32 %v1668_v21, %v1141_v23  ;;  %v1164_v41 = vmax.f32 %v1160_v33, 0.0 }
 0x232   : > { %v1671_v17 = vadd.f32 %v1670_v12, %v1669_v11 }
 0x233   : > { %v1672_v14 = vpop.f32.mrf.mxu0  ;;  %v1161_v37 = vadd.f32 %v1562_v26, %v1142_v28 }
 0x234   : > { %v1147_v22 = vadd.f32 %v1733_v13, %v1671_v17 }
 0x235   : > { %v1673_v16 = vpop.f32.mrf.mxu0  ;;  %v1165_v47 = vmax.f32 %v1161_v37, 0.0 }
 0x236   : > { %v1674_v20 = vadd.f32 %v1673_v16, %v1672_v14  ;;  %v1162_v31 = vadd.f32 %v1562_v26, %v1147_v22 }
 0x238   : > { %v1150_v30 = vadd.f32 %v1734_v18, %v1674_v20  ;;  %v1166_v38 = vmax.f32 %v1162_v31, 0.0 }
 0x23a   : > { %v1163_v34 = vadd.f32 %v1562_v26, %v1150_v30 }
 0x23c   : > { %v1167_v44 = vmax.f32 %v1163_v34, 0.0 }
 0x247   : > { %v1753_v32 = vpop.f32.mrf.mxu0 }
 0x248   : > { %v1294_v35 = vadd.f32 %v1753_v32, %v1573_v27 }
 0x249   : > { %v1270_v36 = vpop.f32.mrf.mxu0 }
 0x24a   : > { %v1292_v39 = vadd.f32 %v1573_v27, %v1270_v36  ;;  %v1298_v42 = vadd.f32 %v1294_v35, %v1166_v38 }
 0x24b   : > { %v1754_v40 = vpop.f32.mrf.mxu0 }
 0x24c   : > { %v1295_v45 = vadd.f32 %v1754_v40, %v1573_v27  ;;  %v1296_v48 = vadd.f32 %v1292_v39, %v1164_v41  ;;  %v1302_v51 = vmax.f32 %v1298_v42, 0.0 }
 0x24d   : > { %v1273_v46 = vpop.f32.mrf.mxu0 }
 0x24e   : > { %v1299_v49 = vadd.f32 %v1295_v45, %v1167_v44  ;;  %v1293_v50 = vadd.f32 %v1573_v27, %v1273_v46  ;;  %v1300_v54 = vmax.f32 %v1296_v48, 0.0 }
 0x250   : > { %v1303_v52 = vmax.f32 %v1299_v49, 0.0  ;;  %v1297_v53 = vadd.f32 %v1293_v50, %v1165_v47 }
 0x252   : > { %v1601_v55 = vpack.c.bf16 %v1303_v52, %v1302_v51  ;;  %v1301_v56 = vmax.f32 %v1297_v53, 0.0 }
 0x254   : > { %1608 = vst [vmem:[%s2302_s11 + $0x8] sm:$0xff] %v1601_v55   ;;  %v1596_v57 = vpack.c.bf16 %v1301_v56, %v1300_v54 }
 0x256   : > { %1597 = vst [vmem:[%s2302_s11] sm:$0xff] %v1596_v57  }
 0x257   : > { %s1592_s16 = sshll.u32 %s2066_s27, 7  ;;  %s1361_s21 = sshll.u32 %s2302_s11, 4  ;;  %s1362_s21 = int_to_ptr.vmem [resolvable:$true] %s1361_s21 }
 0x258   : > { %s1350_s10 = scalar_lea.hbm %s2426_s7, %s1592_s16  ;;  %s2088_s13 = smov 128  }
 0x259   : > { %p2444_p5 = scmp.ne.s32.totalorder %s2436_s15, 0  ;;  %s2089_s1 = smov 256  }
 0x25a   : > { %s2090_s3 = smov 2   ;;  %s2091_s5 = smov 64  }
 0x25b   : > { %1776 = sst [smem:[#allocation16]] (%p2444_p5), %s2088_s13  ;;  %s2092_s27 = smov 4  }
 0x25c   : > { %1777 = sst [smem:[#allocation16 + $0x1]] (%p2444_p5), %s2089_s1  ;;  %s2093_s19 = smov 131072  }
 0x25d   : > { %1778 = sst [smem:[#allocation16 + $0x2]] (%p2444_p5), %s2090_s3  ;;  %s2094_s11 = smov 0  }
 0x25e   : > { %1779 = sst [smem:[#allocation16 + $0x3]] (%p2444_p5), %s2091_s5 }
 0x25f   : > { %1780 = sst [smem:[#allocation16 + $0x4]] (%p2444_p5), %s2091_s5 }
 0x260   : > { %1781 = sst [smem:[#allocation16 + $0x5]] (%p2444_p5), %s2092_s27 }
 0x261   : > { %1782 = dma.general (%p2444_p5), %s1362_s21, 256, %s1350_s10, %s1335_s9, %s2093_s19, [#allocation16], %s2094_s11, 0  }
 0x262 PF: > { %s1389_s12 = sand.u32 1, %s2054_s24   ;;  %p2445_p8 = scmp.ne.s32.totalorder %s2438_s17, 0 }
 0x263   : > { %s1390_s14 = scalar_lea.sflag [#allocation6], %s1389_s12 }
 0x264   : > { %p1795_p9 = pnand %p1496_p1, %p2445_p8 }
 0x266   : > { %p1796_p0 = pneg %p1795_p9 }
 0x268   : > { %2049 = dma.done.wait (%p1796_p0), %s1390_s14, 256  }
 0x269   : > { %2051 = vsyncadd (%p1796_p0), %s1390_s14, 4294967040  ;;  %s25_s29 = sadd.s32 1, %s2074_s29   ;;  %s2446_s18 = sld [smem:[#allocation23_spill]] }
 0x26a   : > { %p22_p2 = scmp.ge.s32.totalorder %s25_s29, 4   ;;  %s2447_s15 = sld [smem:[#allocation22_spill]] }
 0x26b   : > { %s2448_s24 = smov %s2058_s25  ;;  %s2449_s25 = smov %s2062_s26 }
 0x26c   : > { %s2451_s27 = smov %s2070_s28  ;;  %24 = sbr.rel (!%p22_p2) target bundleno = 12 (0xc), region = 119 }
 0x26f   : > { %s2450_s26 = smov %s2446_s18 }
 0x270   : > { %s2452_s28 = smov %s2447_s15 }
 0x271   :  { %1395 = vsyncpa [#allocation5], 1 }
 0x272   :  { %1397 = vsyncpa [#allocation5 + $0x1], 1 }
 0x273   :  { %1398 = vsyncpa [#allocation8], 1 }
 0x274   :  { %1399 = vsyncpa [#allocation11], 1 }
 0x275   :  { %1400 = vsyncpa [#allocation6], 1 }
 0x276   :  { %1402 = vsyncpa [#allocation6 + $0x1], 1 }

</bundles_post_ra>
